<compile_context>
chip_gen: v7x
topology: tpu7x:2x2x1
jax: 0.10.0
libtpu: 0.0.40
codegen_flags: <defaults>
</compile_context>

<pallas_src>
import functools

import jax
import jax.numpy as jnp
from jax.experimental import pallas as pl
from jax.experimental.pallas import tpu as pltpu


def _round_up(n, m):
    return ((n + m - 1) // m) * m


def init_params(key, in_dim, structure):
    """Deterministic init mimicking torch.nn.Linear's U(-1/sqrt(fan_in), +1/sqrt(fan_in)).

    Weights stored as [in_features, out_features] (transposed vs. torch),
    biases as [1, out_features].
    """
    dims = [in_dim] + list(structure) + [1]
    params = {}
    for idx in range(3):
        fan_in, fan_out = dims[idx], dims[idx + 1]
        key, kw, kb = jax.random.split(key, 3)
        bound = 1.0 / jnp.sqrt(jnp.float32(fan_in))
        params[f"w{idx + 1}"] = jax.random.uniform(
            kw, (fan_in, fan_out), jnp.float32, -bound, bound)
        params[f"b{idx + 1}"] = jax.random.uniform(
            kb, (1, fan_out), jnp.float32, -bound, bound)
    return params


def pack_params(params, in_dim, hidden, group=None):
    """Pack (w1,b1,w2,b2,w3,b3) into one block-diagonal [rows, group*hidden] f32 array.

    group boards are processed per packed row.  Sections start on 8-row (f32 sublane)
    boundaries.  W1/W2 are block-diagonal with `group` copies; b1/b2/w3 are tiled
    across the lane dim; b3 is broadcast.  Returns (packed_array, static_offsets).
    """
    if group is None:
        group = max(1, 128 // hidden)
    lanes = group * hidden
    kg = group * in_dim                      # packed layer-1 contraction size

    off_w1 = 0
    off_b1 = _round_up(off_w1 + kg, 8)
    off_w2 = _round_up(off_b1 + 1, 8)
    off_b2 = _round_up(off_w2 + lanes, 8)
    off_w3 = _round_up(off_b2 + 1, 8)
    off_b3 = _round_up(off_w3 + 1, 8)
    rows = _round_up(off_b3 + 1, 8)

    packed = jnp.zeros((rows, lanes), jnp.float32)
    for g in range(group):
        packed = packed.at[off_w1 + g * in_dim: off_w1 + (g + 1) * in_dim,
                           g * hidden:(g + 1) * hidden].set(params["w1"])
        packed = packed.at[off_w2 + g * hidden: off_w2 + (g + 1) * hidden,
                           g * hidden:(g + 1) * hidden].set(params["w2"])
    packed = packed.at[off_b1, :].set(jnp.tile(params["b1"][0], group))
    packed = packed.at[off_b2, :].set(jnp.tile(params["b2"][0], group))
    packed = packed.at[off_w3, :].set(jnp.tile(params["w3"][:, 0], group))
    packed = packed.at[off_b3, :].set(jnp.broadcast_to(params["b3"][0, 0], (lanes,)))

    offsets = dict(w1=off_w1, b1=off_b1, w2=off_w2, b2=off_b2, w3=off_w3, b3=off_b3,
                   in_dim=in_dim, hidden=hidden, group=group, kg=kg, lanes=lanes,
                   rows=rows)
    return packed, offsets


def _make_kernel(offsets):
    o_w1, o_b1 = offsets["w1"], offsets["b1"]
    o_w2, o_b2 = offsets["w2"], offsets["b2"]
    o_w3, o_b3 = offsets["w3"], offsets["b3"]
    kg, lanes = offsets["kg"], offsets["lanes"]
    hidden, group = offsets["hidden"], offsets["group"]

    def kernel(x_ref, p_ref, o_ref):
        x = x_ref[...]                                    # (tbg, kg)  4 boards / row

        w1 = p_ref[o_w1:o_w1 + kg, :]                     # (kg, lanes)   block-diag
        b1 = p_ref[o_b1:o_b1 + 1, :]                      # (1, lanes)    tiled
        w2 = p_ref[o_w2:o_w2 + lanes, :]                  # (lanes, lanes) block-diag
        b2 = p_ref[o_b2:o_b2 + 1, :]                      # (1, lanes)    tiled
        w3 = p_ref[o_w3:o_w3 + 1, :]                      # (1, lanes)    tiled w3
        b3 = p_ref[o_b3:o_b3 + 1, 0:1]                    # (1, 1)

        h1 = jnp.maximum(
            jnp.dot(x, w1, preferred_element_type=jnp.float32) + b1, 0.0)
        h2 = jnp.maximum(
            jnp.dot(h1, w2, preferred_element_type=jnp.float32) + b2, 0.0)

        # Final layer: 1 output per board.  Keep it off the MXU (a (tbg,lanes)@(lanes,G)
        # matmul would cost another full row-push pass); VPU multiply + per-hidden-group
        # lane reductions instead, assembled with cheap elementwise selects.
        t = h2 * w3                                       # (tbg, lanes)
        tbg = t.shape[0]
        lane_ids = jax.lax.broadcasted_iota(jnp.int32, (tbg, group), 1)
        out = jnp.zeros((tbg, group), jnp.float32)
        for g in range(group):
            col = jnp.sum(t[:, g * hidden:(g + 1) * hidden], axis=-1, keepdims=True)
            out = jnp.where(lane_ids == g, col, out)
        o_ref[...] = (out + b3).astype(o_ref.dtype)       # (tbg, group)

    return kernel


@functools.partial(jax.jit, static_argnames=("tile_boards", "offsets_key"))
def _forward_impl(x, packed_params, *, tile_boards, offsets_key):
    offsets = dict(offsets_key)
    group = offsets["group"]
    kg = offsets["kg"]

    B, _ = x.shape

    # Pad the batch only up to a multiple of `group` (<= group-1 rows, rare) so the
    # G-packed view is a free row-major reshape.  No full K/tile padding of x.
    b_pad = _round_up(B, group)
    if b_pad != B:
        x = jnp.pad(x, ((0, b_pad - B), (0, 0)))
    bg = b_pad // group
    xg = x.reshape(bg, kg)                    # free: identical bytes, row-major

    # Batch tile in packed rows (each row = `group` boards); multiple of 8 sublanes.
    tbg = max(8, min(tile_boards // group, _round_up(bg, 8)))
    tbg = _round_up(tbg, 8)
    # Ragged last block: OOB reads give per-row garbage whose OOB output writes are
    # dropped by Pallas; the row-wise MLP never mixes rows, so valid rows are exact.
    grid = (pl.cdiv(bg, tbg),)

    n_rows, n_lanes = packed_params.shape

    out = pl.pallas_call(
        _make_kernel(offsets),
        out_shape=jax.ShapeDtypeStruct((bg, group), jnp.float32),
        grid_spec=pltpu.PrefetchScalarGridSpec(
            num_scalar_prefetch=0,
            grid=grid,
            in_specs=[
                # x tile marches along the packed-batch axis (auto double-buffered).
                pl.BlockSpec((tbg, kg), lambda i: (i, 0)),
                # Packed params: constant block index -> stays VMEM-resident.
                pl.BlockSpec((n_rows, n_lanes), lambda i: (0, 0)),
            ],
            out_specs=pl.BlockSpec((tbg, group), lambda i: (i, 0)),
        ),
        compiler_params=pltpu.CompilerParams(
            # Independent batch tiles: lets v7x shard the grid across its 2 TCs.
            dimension_semantics=("parallel",),
            # Above v5e's 16 MiB scoped default, well under v7x's 64 MiB physical.
            vmem_limit_bytes=32 * 1024 * 1024,
        ),
    )(xg, packed_params)

    # (bg, group) row-major == (b_pad, 1); drop the (rare) pad rows.
    out = out.reshape(b_pad, 1)
    return out if b_pad == B else out[:B]


def nnet_approx_forward(x, packed_params, offsets, *, tile_boards=8192):
    """x: [B, in_dim] f32; packed_params/offsets from pack_params().

    Returns [B, 1] f32, matching NNetApprox.forward / self.net(x).
    """
    assert x.shape[1] == offsets["in_dim"], "feature dim mismatch"
    return _forward_impl(
        x, packed_params,
        tile_boards=int(tile_boards),
        offsets_key=tuple(sorted(offsets.items())),
    )


def _reference_forward(x, params):
    h = jnp.maximum(x @ params["w1"] + params["b1"], 0.0)
    h = jnp.maximum(h @ params["w2"] + params["b2"], 0.0)
    return h @ params["w3"] + params["b3"]


# TODO(synk): training (MSELoss + SGD step in train_batch), save/load and the
# StateVector->tensor host conversion are host-side torch machinery, not part of
# forward(); only the nn.Sequential forward is kernelized.

if __name__ == "__main__":
    size_of_board = 8
    in_dim = size_of_board ** 2 // 2 + 1   # 33
    structure = [32, 32]

    assert structure[0] == structure[1], "packed layout assumes equal hidden widths"

    key = jax.random.PRNGKey(0)
    key, kx = jax.random.split(key)
    params = init_params(key, in_dim, structure)
    packed, offsets = pack_params(params, in_dim, structure[0])

    # Typical small batch (B=8): single grid step, zero wrapper-side copies of x.
    x = jax.random.normal(kx, (8, in_dim), jnp.float32)
    out = jax.block_until_ready(nnet_approx_forward(x, packed, offsets))
    ref = _reference_forward(x, params)
    assert out.shape == (8, 1)
    assert jnp.allclose(out, ref, atol=1e-4, rtol=1e-4), "mismatch vs reference (B=8)"

    # Multi-step grid with a ragged last block (B=300 boards, tile_boards=128).
    key, kx2 = jax.random.split(key)
    x2 = jax.random.normal(kx2, (300, in_dim), jnp.float32)
    out2 = jax.block_until_ready(
        nnet_approx_forward(x2, packed, offsets, tile_boards=128))
    ref2 = _reference_forward(x2, params)
    assert out2.shape == (300, 1)
    assert jnp.allclose(out2, ref2, atol=1e-4, rtol=1e-4), "mismatch vs reference (B=300)"

    # Batch not a multiple of the packing group (exercises the tiny tail pad).
    key, kx3 = jax.random.split(key)
    x3 = jax.random.normal(kx3, (10, in_dim), jnp.float32)
    out3 = jax.block_until_ready(nnet_approx_forward(x3, packed, offsets))
    ref3 = _reference_forward(x3, params)
    assert out3.shape == (10, 1)
    assert jnp.allclose(out3, ref3, atol=1e-4, rtol=1e-4), "mismatch vs reference (B=10)"

    print("KERNEL_OK")
</pallas_src>

<mosaic_0001>
module attributes {stable_mosaic.version = 11 : i64} {
  func.func @kernel(%arg0: i32, %arg1: memref<8x132xf32, #tpu.memory_space<vmem>>, %arg2: memref<296x128xf32, #tpu.memory_space<vmem>>, %arg3: memref<8x4xf32, #tpu.memory_space<vmem>>) attributes {dimension_semantics = [#tpu.dimension_semantics<parallel>], iteration_bounds = array<i64: 1>, scalar_prefetch = 0 : i64, scratch_operands = 0 : i64, tpu.core_type = #tpu.core_type<tc>, window_params = [{transform_indices = @transform_0, window_bounds = array<i64: 8, 132>}, {pipeline_mode = #tpu.pipeline_mode<synchronous>, transform_indices = @transform_1, window_bounds = array<i64: 296, 128>}, {transform_indices = @transform_2, window_bounds = array<i64: 8, 4>}]} {
    %c0 = arith.constant 0 : index
    %c0_0 = arith.constant 0 : index
    %0 = vector.load %arg1[%c0, %c0_0] : memref<8x132xf32, #tpu.memory_space<vmem>>, vector<8x132xf32>
    %c0_1 = arith.constant 0 : index
    %c0_2 = arith.constant 0 : index
    %1 = vector.load %arg2[%c0_1, %c0_2] : memref<296x128xf32, #tpu.memory_space<vmem>>, vector<132x128xf32>
    %c136 = arith.constant 136 : index
    %c0_3 = arith.constant 0 : index
    %2 = vector.load %arg2[%c136, %c0_3] : memref<296x128xf32, #tpu.memory_space<vmem>>, vector<1x128xf32>
    %c144 = arith.constant 144 : index
    %c0_4 = arith.constant 0 : index
    %3 = vector.load %arg2[%c144, %c0_4] : memref<296x128xf32, #tpu.memory_space<vmem>>, vector<128x128xf32>
    %c272 = arith.constant 272 : index
    %c0_5 = arith.constant 0 : index
    %4 = vector.load %arg2[%c272, %c0_5] : memref<296x128xf32, #tpu.memory_space<vmem>>, vector<1x128xf32>
    %c280 = arith.constant 280 : index
    %c0_6 = arith.constant 0 : index
    %5 = vector.load %arg2[%c280, %c0_6] : memref<296x128xf32, #tpu.memory_space<vmem>>, vector<1x128xf32>
    %c288 = arith.constant 288 : index
    %c0_7 = arith.constant 0 : index
    %6 = vector.load %arg2[%c288, %c0_7] : memref<296x128xf32, #tpu.memory_space<vmem>>, vector<1x1xf32>
    %cst = arith.constant dense<0.000000e+00> : vector<8x128xf32>
    %7 = tpu.matmul %0, %1, %cst {dimension_numbers = #tpu.dot_dimension_numbers<[1], [0], [0], [1], [0, 0, 1, 1], [], []>} : vector<8x132xf32>, vector<132x128xf32>, vector<8x128xf32> -> vector<8x128xf32>
    %8 = vector.broadcast %2 : vector<1x128xf32> to vector<8x128xf32>
    %9 = arith.addf %7, %8 : vector<8x128xf32>
    %cst_8 = arith.constant 0.000000e+00 : f32
    %10 = vector.broadcast %cst_8 : f32 to vector<8x128xf32>
    %11 = arith.maximumf %9, %10 : vector<8x128xf32>
    %cst_9 = arith.constant dense<0.000000e+00> : vector<8x128xf32>
    %12 = tpu.matmul %11, %3, %cst_9 {dimension_numbers = #tpu.dot_dimension_numbers<[1], [0], [0], [1], [0, 0, 1, 1], [], []>} : vector<8x128xf32>, vector<128x128xf32>, vector<8x128xf32> -> vector<8x128xf32>
    %13 = vector.broadcast %4 : vector<1x128xf32> to vector<8x128xf32>
    %14 = arith.addf %12, %13 : vector<8x128xf32>
    %cst_10 = arith.constant 0.000000e+00 : f32
    %15 = vector.broadcast %cst_10 : f32 to vector<8x128xf32>
    %16 = arith.maximumf %14, %15 : vector<8x128xf32>
    %17 = vector.broadcast %5 : vector<1x128xf32> to vector<8x128xf32>
    %18 = arith.mulf %16, %17 : vector<8x128xf32>
    %19 = tpu.iota {dimensions = array<i32: 1>} : vector<8x4xi32>
    %cst_11 = arith.constant 0.000000e+00 : f32
    %20 = vector.broadcast %cst_11 : f32 to vector<8x4xf32>
    %21 = vector.extract_strided_slice %18 {offsets = [0, 0], sizes = [8, 32], strides = [1, 1]} : vector<8x128xf32> to vector<8x32xf32>
    %cst_12 = arith.constant dense<0.000000e+00> : vector<8xf32>
    %22 = vector.multi_reduction <add>, %21, %cst_12 [1] : vector<8x32xf32> to vector<8xf32>
    %23 = vector.shape_cast %22 : vector<8xf32> to vector<8x1xf32>
    %c0_i32 = arith.constant 0 : i32
    %24 = vector.broadcast %c0_i32 : i32 to vector<8x4xi32>
    %25 = arith.cmpi eq, %19, %24 : vector<8x4xi32>
    %26 = vector.shape_cast %23 : vector<8x1xf32> to vector<8x1xf32>
    %27 = vector.broadcast %26 : vector<8x1xf32> to vector<8x4xf32>
    %28 = arith.select %25, %27, %20 : vector<8x4xi1>, vector<8x4xf32>
    %29 = vector.extract_strided_slice %18 {offsets = [0, 32], sizes = [8, 32], strides = [1, 1]} : vector<8x128xf32> to vector<8x32xf32>
    %cst_13 = arith.constant dense<0.000000e+00> : vector<8xf32>
    %30 = vector.multi_reduction <add>, %29, %cst_13 [1] : vector<8x32xf32> to vector<8xf32>
    %31 = vector.shape_cast %30 : vector<8xf32> to vector<8x1xf32>
    %c1_i32 = arith.constant 1 : i32
    %32 = vector.broadcast %c1_i32 : i32 to vector<8x4xi32>
    %33 = arith.cmpi eq, %19, %32 : vector<8x4xi32>
    %34 = vector.shape_cast %31 : vector<8x1xf32> to vector<8x1xf32>
    %35 = vector.broadcast %34 : vector<8x1xf32> to vector<8x4xf32>
    %36 = arith.select %33, %35, %28 : vector<8x4xi1>, vector<8x4xf32>
    %37 = vector.extract_strided_slice %18 {offsets = [0, 64], sizes = [8, 32], strides = [1, 1]} : vector<8x128xf32> to vector<8x32xf32>
    %cst_14 = arith.constant dense<0.000000e+00> : vector<8xf32>
    %38 = vector.multi_reduction <add>, %37, %cst_14 [1] : vector<8x32xf32> to vector<8xf32>
    %39 = vector.shape_cast %38 : vector<8xf32> to vector<8x1xf32>
    %c2_i32 = arith.constant 2 : i32
    %40 = vector.broadcast %c2_i32 : i32 to vector<8x4xi32>
    %41 = arith.cmpi eq, %19, %40 : vector<8x4xi32>
    %42 = vector.shape_cast %39 : vector<8x1xf32> to vector<8x1xf32>
    %43 = vector.broadcast %42 : vector<8x1xf32> to vector<8x4xf32>
    %44 = arith.select %41, %43, %36 : vector<8x4xi1>, vector<8x4xf32>
    %45 = vector.extract_strided_slice %18 {offsets = [0, 96], sizes = [8, 32], strides = [1, 1]} : vector<8x128xf32> to vector<8x32xf32>
    %cst_15 = arith.constant dense<0.000000e+00> : vector<8xf32>
    %46 = vector.multi_reduction <add>, %45, %cst_15 [1] : vector<8x32xf32> to vector<8xf32>
    %47 = vector.shape_cast %46 : vector<8xf32> to vector<8x1xf32>
    %c3_i32 = arith.constant 3 : i32
    %48 = vector.broadcast %c3_i32 : i32 to vector<8x4xi32>
    %49 = arith.cmpi eq, %19, %48 : vector<8x4xi32>
    %50 = vector.shape_cast %47 : vector<8x1xf32> to vector<8x1xf32>
    %51 = vector.broadcast %50 : vector<8x1xf32> to vector<8x4xf32>
    %52 = arith.select %49, %51, %44 : vector<8x4xi1>, vector<8x4xf32>
    %53 = vector.broadcast %6 : vector<1x1xf32> to vector<8x4xf32>
    %54 = arith.addf %52, %53 : vector<8x4xf32>
    %c0_16 = arith.constant 0 : index
    %c0_17 = arith.constant 0 : index
    %55 = vector.load %arg3[%c0_16, %c0_17] : memref<8x4xf32, #tpu.memory_space<vmem>>, vector<8x4xf32>
    tpu.vector_store %arg3[%c0_16, %c0_17], %54 {strides = array<i32>} : memref<8x4xf32, #tpu.memory_space<vmem>>, vector<8x4xf32>,
    return
  }
  func.func @transform_0(%arg0: i32) -> (i32, i32) {
    %c0_i32 = arith.constant 0 : i32
    %c0_i32_0 = arith.constant 0 : i32
    return %arg0, %c0_i32 : i32, i32
  }
  func.func @transform_1(%arg0: i32) -> (i32, i32) {
    %c0_i32 = arith.constant 0 : i32
    %c0_i32_0 = arith.constant 0 : i32
    %c0_i32_1 = arith.constant 0 : i32
    return %c0_i32, %c0_i32_0 : i32, i32
  }
  func.func @transform_2(%arg0: i32) -> (i32, i32) {
    %c0_i32 = arith.constant 0 : i32
    %c0_i32_0 = arith.constant 0 : i32
    return %arg0, %c0_i32 : i32, i32
  }
}

</mosaic_0001>

<bundles_post_ra>
// kernel: _forward_impl.1
= control target key start
LH: loop header
LB: loop body
LE: loop exit
PB: predicated region body
PF: predicated region fallthrough
CT: control target
= control target key end

     0   :  { %7 = vsyncpa [#allocation3], 0  ;;  %s475_s9 = smov [#allocation2]   ;;  %s547_s0 = inlined_call_operand.vmem [shape: f32[2,132], index: 0, kind: input, shape index: {}]   ;;  %s548_s1 = inlined_call_operand.hbm [shape: f32[296,128], index: 1, kind: input, shape index: {}]   ;;  %s549_s2 = inlined_call_operand.vmem [shape: f32[2,4], index: 2, kind: output, shape index: {}]  }
   0x1   :  { %s15_s10 = sshll.u32 %s475_s9, 4  ;;  %s451_s13 = scalar_lea.hbm %s548_s1, 4736  ;;  %s16_s10 = int_to_ptr.vmem [resolvable:$true] %s15_s10 }
   0x2   :  { %p452_p0 = scmp.ne.s32.totalorder %s548_s1, %s451_s13  ;;  %p455_p1 = scmp.lt.u32.totalorder %s451_s13, %s548_s1 }
   0x4   :  { %p457_p2 = pnand %p455_p1, %p452_p0 }
   0x6   :  { %460 = shalt.err (!%p457_p2)
}
   0x7   :  { %s461_s18 = scalar_lea.vmem %s16_s10, 4736  ;;  %p466_p4 = scmp.lt.s32.totalorder %s16_s10, %s16_s10 }
   0x8   :  { %p462_p3 = scmp.ne.s32.totalorder %s16_s10, %s461_s18  ;;  %p467_p5 = scmp.lt.s32.totalorder %s461_s18, %s461_s18 }
   0xa   :  { %p468_p6 = por %p467_p5, %p466_p4 }
   0xc   :  { %p469_p7 = pnand %p468_p6, %p462_p3 }
   0xe   :  { %472 = shalt.err (!%p469_p7)
}
   0xf   :  { %s476_s19 = smov 128   ;;  %s477_s20 = smov 8  }
  0x10   :  { %21 = dma.hbm_to_vmem [thread:$0]  %s548_s1, 4736, %s16_s10, [#allocation3], %s476_s19, %s476_s19, %s477_s20  }
  0x11   :  { %473 = dma.done.wait [#allocation3], 4736  }
  0x12   :  { %474 = vsyncadd [#allocation3], 4294962560  ;;  %v478_v0 = vmov 0.0|0.0   ;;  %v79_v1 = vlaneseq  ;;  %v29_v2 = vld [vmem:[#allocation2] sm:$0xff]  ;;  %v30_v3 = vld [vmem:[#allocation2 + $0x8] sm:$0xff]  ;;  %vm93_vm0 = vcmask 31744  }
  0x13   :  { %387 = vmatprep.subr.bf16.mxu0 %v478_v0  ;;  %411 = vmatprep.subr.bf16.mxu1 %v478_v0  ;;  %v31_v4 = vld [vmem:[#allocation2 + $0x10] sm:$0xff]  ;;  %v388_v5 = vpack.c.bf16 %v30_v3, %v29_v2  ;;  %v32_v6 = vld [vmem:[#allocation2 + $0x18] sm:$0xff]  ;;  %v33_v8 = vld [vmem:[#allocation2 + $0x20] sm:$0xff]  ;;  %v479_v50 = vmov 0.0   ;;  %vm96_vm1 = vcmask 1043456   ;;  %vm480_vm2 = vmmov 0  }
  0x14   :  { %v391_v7 = vpack.c.bf16 %v32_v6, %v31_v4  ;;  %v34_v9 = vld [vmem:[#allocation2 + $0x28] sm:$0xff]  ;;  %v35_v10 = vld [vmem:[#allocation2 + $0x30] sm:$0xff]  ;;  %v36_v11 = vld [vmem:[#allocation2 + $0x38] sm:$0xff]  ;;  %384 = vmatprep.mubr.msk.f32.mxu1 %vm480_vm2, %v479_v50  ;;  %s482_s26 = smov 96   ;;  %s483_s27 = smov 64   ;;  %vm253_vm3 = vcmask 261120  }
  0x15   :  { %389 = vmatpush1.bf16.msra.mxu0 %v388_v5  ;;  %v394_v12 = vpack.c.bf16 %v34_v9, %v33_v8  ;;  %v517_v13 = vld.sshfl [vmem:[%s547_s0] sm:$0xff pattern:$0x76325410]  ;;  %v522_v14 = vld.sshfl [vmem:[%s547_s0 + $0x8] sm:$0xff pattern:$0x76325410]  ;;  %v397_v20 = vpack.c.bf16 %v36_v11, %v35_v10 }
  0x16   :  { %390 = vmatprep.subr.bf16.mxu0 %v478_v0  ;;  %v47_v15 = vld [vmem:[#allocation2 + $0x90] sm:$0xff]  ;;  %v48_v16 = vld [vmem:[#allocation2 + $0x98] sm:$0xff]  ;;  %v49_v17 = vld [vmem:[#allocation2 + $0xa0] sm:$0xff]  ;;  %v91_v22 = vcombine.high %v517_v13, %v522_v14  ;;  %v90_v52 = vcombine.low %v517_v13, %v522_v14  ;;  %s481_s0 = smov 32   ;;  %v252_v13 = vand.u32 127, %v79_v1 }
  0x17   :  { %v50_v18 = vld [vmem:[#allocation2 + $0xa8] sm:$0xff]  ;;  %v412_v19 = vpack.c.bf16 %v48_v16, %v47_v15  ;;  %v37_v21 = vld [vmem:[#allocation2 + $0x40] sm:$0xff]  ;;  %v51_v25 = vld [vmem:[#allocation2 + $0xb0] sm:$0xff] }
  0x18   :  { %v415_v23 = vpack.c.bf16 %v50_v18, %v49_v17  ;;  %v38_v24 = vld [vmem:[#allocation2 + $0x48] sm:$0xff]  ;;  %v52_v26 = vld [vmem:[#allocation2 + $0xb8] sm:$0xff]  ;;  %332 = vmatprep.mubr.msk.f32.mxu0 %vm93_vm0, %v91_v22  ;;  %v39_v28 = vld [vmem:[#allocation2 + $0x50] sm:$0xff]  ;;  %vm257_vm4 = vcmp.eq.s32.totalorder %v252_v13, 0  ;;  %vm266_vm5 = vcmp.eq.s32.totalorder %v252_v13, 1  ;;  %vm274_vm6 = vcmp.eq.s32.totalorder %v252_v13, 2 }
  0x19   :  { %392 = vmatpush1.bf16.msra.mxu0 %v391_v7  ;;  %413 = vmatpush3.bf16.msra.mxu1 %v412_v19  ;;  %v400_v27 = vpack.c.bf16 %v38_v24, %v37_v21  ;;  %v418_v29 = vpack.c.bf16 %v52_v26, %v51_v25  ;;  %v40_v30 = vld [vmem:[#allocation2 + $0x58] sm:$0xff]  ;;  %v53_v31 = vld [vmem:[#allocation2 + $0xc0] sm:$0xff]  ;;  %v54_v32 = vld [vmem:[#allocation2 + $0xc8] sm:$0xff]  ;;  %vm282_vm7 = vcmp.eq.s32.totalorder %v252_v13, 3 }
  0x1a   :  { %393 = vmatprep.subr.bf16.mxu0 %v478_v0  ;;  %414 = vmatprep.subr.bf16.mxu1 %v478_v0  ;;  %v403_v33 = vpack.c.bf16 %v40_v30, %v39_v28  ;;  %v41_v34 = vld [vmem:[#allocation2 + $0x60] sm:$0xff]  ;;  %v421_v35 = vpack.c.bf16 %v54_v32, %v53_v31  ;;  %v42_v36 = vld [vmem:[#allocation2 + $0x68] sm:$0xff]  ;;  %v55_v37 = vld [vmem:[#allocation2 + $0xd0] sm:$0xff] }
  0x1b   :  { %v56_v38 = vld [vmem:[#allocation2 + $0xd8] sm:$0xff]  ;;  %v406_v39 = vpack.c.bf16 %v42_v36, %v41_v34  ;;  %v43_v40 = vld [vmem:[#allocation2 + $0x70] sm:$0xff]  ;;  %v57_v43 = vld [vmem:[#allocation2 + $0xe0] sm:$0xff] }
  0x1c   :  { %v424_v41 = vpack.c.bf16 %v56_v38, %v55_v37  ;;  %v44_v42 = vld [vmem:[#allocation2 + $0x78] sm:$0xff]  ;;  %v58_v44 = vld [vmem:[#allocation2 + $0xe8] sm:$0xff]  ;;  %v59_v47 = vld [vmem:[#allocation2 + $0xf0] sm:$0xff] }
  0x1d   :  { %395 = vmatpush1.bf16.msra.mxu0 %v394_v12  ;;  %416 = vmatpush3.bf16.msra.mxu1 %v415_v23  ;;  %v409_v45 = vpack.c.bf16 %v44_v42, %v43_v40  ;;  %v427_v46 = vpack.c.bf16 %v58_v44, %v57_v43  ;;  %v60_v48 = vld [vmem:[#allocation2 + $0xf8] sm:$0xff]  ;;  %v45_v51 = vld [vmem:[#allocation2 + $0x80] sm:$0xf]  ;;  %v62_v54 = vld [vmem:[#allocation2 + $0x108] sm:$0xff] }
  0x1e   :  { %396 = vmatprep.subr.bf16.mxu0 %v478_v0  ;;  %417 = vmatprep.subr.bf16.mxu1 %v478_v0  ;;  %v430_v49 = vpack.c.bf16 %v60_v48, %v59_v47  ;;  %v61_v53 = vld [vmem:[#allocation2 + $0x100] sm:$0xff]  ;;  %v330_v56 = vld [vmem:[#allocation2 + $0x88] ss:$0 sm:$0xff]  ;;  %v333_v61 = vld [vmem:[#allocation2 + $0x110] ss:$0 sm:$0xff] }
  0x1f   :  { %v433_v55 = vpack.c.bf16 %v62_v54, %v61_v53  ;;  %v334_v3 = vld [vmem:[#allocation2 + $0x118] ss:$0 sm:$0xff]  ;;  %v65_v6 = vld [vmem:[#allocation2 + $0x120] sm:$0x1] }
  0x20   :  { %435 = vpush %v65_v6 }
  0x21   :  { %398 = vmatpush1.bf16.msra.mxu0 %v397_v20  ;;  %419 = vmatpush3.bf16.msra.mxu1 %v418_v29 }
  0x22   :  { %399 = vmatprep.subr.bf16.mxu0 %v478_v0  ;;  %420 = vmatprep.subr.bf16.mxu1 %v478_v0 }
  0x25   :  { %401 = vmatpush1.bf16.msra.mxu0 %v400_v27  ;;  %422 = vmatpush3.bf16.msra.mxu1 %v421_v35 }
  0x26   :  { %402 = vmatprep.subr.bf16.mxu0 %v478_v0  ;;  %423 = vmatprep.subr.bf16.mxu1 %v478_v0 }
  0x29   :  { %404 = vmatpush1.bf16.msra.mxu0 %v403_v33  ;;  %425 = vmatpush3.bf16.msra.mxu1 %v424_v41 }
  0x2a   :  { %405 = vmatprep.subr.bf16.mxu0 %v478_v0  ;;  %426 = vmatprep.subr.bf16.mxu1 %v478_v0 }
  0x2d   :  { %407 = vmatpush1.bf16.msra.mxu0 %v406_v39  ;;  %428 = vmatpush3.bf16.msra.mxu1 %v427_v46 }
  0x2e   :  { %408 = vmatprep.subr.bf16.mxu0 %v478_v0  ;;  %429 = vmatprep.subr.bf16.mxu1 %v478_v0 }
  0x31   :  { %410 = vmatpush1.bf16.msra.mxu0 %v409_v45  ;;  %431 = vmatpush3.bf16.msra.mxu1 %v430_v49 }
  0x32   :  { %132 = vmatprep.subr.mxu0 %v479_v50  ;;  %432 = vmatprep.subr.bf16.mxu1 %v478_v0 }
  0x35   :  { %331 = vmatpush1.msk.msra.mxu0 %vm96_vm1, %v45_v51  ;;  %434 = vmatpush3.bf16.msra.mxu1 %v433_v55 }
  0x36   :  { %165 = vmatmul.mubr.f32.vlgmr.msra.gmra.mrb[0].mxu0 %v90_v52 }
  0x51   :  { %s436_s28 = spop %435 }
  0x52   :  { %v286_v19 = vstv %s436_s28 }
 0x109   :  { %v166_v57 = vpop.f32.mrb[0].mxu0 }
 0x10a   :  { %v167_v58 = vadd.f32 %v330_v56, %v166_v57  ;;  %v168_v59 = vpop.f32.mrb[1].mxu0 }
 0x10c   :  { %v170_v60 = vmax.f32 %v167_v58, 0.0 }
 0x10e   :  { %385 = vmatmul.mubr.f32.vlgmr.msra.gmra.mrb[0].mxu1 %v170_v60 }
 0x1e1   :  { %v241_v62 = vpop.f32.mrb[0].mxu1 }
 0x1e2   :  { %v242_v63 = vadd.f32 %v333_v61, %v241_v62  ;;  %v386_v2 = vpop.f32.mrb[1].mxu1 }
 0x1e4   :  { %v245_v4 = vmax.f32 %v242_v63, 0.0 }
 0x1e6   :  { %v250_v5 = vmul.f32 %v334_v3, %v245_v4 }
 0x1e8   :  { %276 = vrot.lane.b32.xlu1 %v250_v5, %s481_s0  ;;  %260 = vrot.lane.b32.xlu0 %v250_v5, %s482_s26  ;;  %v254_v0 = vsel %vm253_vm3, %v250_v5, 0.0 }
 0x1ec   :  { %268 = vrot.lane.b32.xlu0 %v250_v5, %s483_s27 }
 0x20c   :  { %255 = vadd.xlane.f32.xlu1 %v254_v0 }
 0x25a   :  { %v277_v7 = vpop.permute.xlu1 %276  ;;  %v261_v8 = vpop.permute.xlu0 %260 }
 0x25b   :  { %v263_v9 = vsel %vm253_vm3, %v261_v8, 0.0  ;;  %v279_v10 = vsel %vm253_vm3, %v277_v7, 0.0 }
 0x25c   :  { %264 = vadd.xlane.f32.xlu0 %v263_v9  ;;  %280 = vadd.xlane.f32.xlu1 %v279_v10 }
 0x25e   :  { %v269_v11 = vpop.permute.xlu0 %268 }
 0x25f   :  { %v271_v12 = vsel %vm253_vm3, %v269_v11, 0.0 }
 0x260   :  { %272 = vadd.xlane.f32.xlu0 %v271_v12 }
 0x299   :  { %v256_v14 = vpop.xlane.xlu1 %255 }
 0x29a   :  { %v258_v16 = vsel %vm257_vm4, %v256_v14, 0.0 }
 0x2e9   :  { %v265_v15 = vpop.xlane.xlu0 %264  ;;  %v281_v20 = vpop.xlane.xlu1 %280 }
 0x2ea   :  { %v267_v17 = vsel %vm266_vm5, %v265_v15, %v258_v16 }
 0x2ed   :  { %v273_v18 = vpop.xlane.xlu0 %272 }
 0x2ee   :  { %v275_v21 = vsel %vm274_vm6, %v273_v18, %v267_v17 }
 0x2ef   :  { %v283_v22 = vsel %vm282_vm7, %v281_v20, %v275_v21 }
 0x2f0   :  { %v288_v23 = vadd.f32 %v286_v19, %v283_v22 }
 0x2f2   :  { %289 = vst.msk [vmem:[#allocation4] sm:$0xff] %vm93_vm0, %v288_v23 }
 0x2f9   :  { %v307_v24 = vld [vmem:[#allocation4] sm:$0x3] }
 0x2fa   :  { %308 = vst [vmem:[%s549_s2] sm:$0x3] %v307_v24 }
 0x2fb   :  { %325 = vsyncpa [#allocation3], 1 }

</bundles_post_ra>
